<compile_context>
chip_gen: v6e
topology: v6e:2x2x1
jax: 0.10.0
libtpu: 0.0.40
codegen_flags: <defaults>
</compile_context>

<pallas_src>
import functools

import jax
import jax.numpy as jnp
from jax.experimental import pallas as pl
from jax.experimental.pallas import tpu as pltpu

A_PAD = 128  # lane-dense channel width used inside the kernel


def _round_up(x, m):
    return (x + m - 1) // m * m


def basenet_kernel(z_ref, w_ref, p_ref, eps_ref, out_ref, *, n_sample, a_pad):
    # ---- fused heads: push Z straight to the MXU, reduce rows afterwards ----
    # sum_n(Z_n @ W) == (sum_n Z_n) @ W, with 1/N folded into the reduce.
    Z = z_ref[...]                                               # (N, z_dim)
    acc = jnp.dot(Z, w_ref[...], preferred_element_type=jnp.float32)  # (N, 2*a_pad)
    acc = jnp.sum(acc, axis=0, keepdims=True) * (1.0 / Z.shape[0])    # (1, 2*a_pad)

    # split at a vreg boundary (a_pad == 128) -> no lane shuffles
    mu = acc[:, :a_pad] + p_ref[0:1, :]                          # fm(z_mean)
    h = jnp.tanh(acc[:, a_pad:] + p_ref[1:2, :])                 # tanh(fv(z_mean))

    # ---- folded eval-mode BatchNorm: scale * h + shift ----
    log_var = h * p_ref[2:3, :] + p_ref[3:4, :]
    std = jnp.exp(0.5 * log_var)

    # ---- assemble the whole (ROWS_PAD, a_pad) slab in-register ----
    #   rows 0 .. n_sample-1 : mu + eps * std      (samples)
    #   row  n_sample        : mu                  (eps row is zero)
    #   row  n_sample+1      : log_var             (eps row is zero)
    #   remaining pad rows   : mu                  (sliced off by the consumer)
    rows_pad = out_ref.shape[0]
    row_id = jax.lax.broadcasted_iota(jnp.int32, (rows_pad, a_pad), 0)
    base = jnp.where(row_id == n_sample + 1, log_var, mu)
    out_ref[...] = base + eps_ref[...] * std                     # ONE full-tile store


def fold_params(Wm, bm, Wv, bv, gamma, beta, rmean, rvar, a_pad=A_PAD):
    """One-time (amortized) folding of BN + weight fusion + lane padding."""
    a_dim = Wm.shape[1]
    assert a_dim <= a_pad, f"a_dim={a_dim} exceeds single-tile width {a_pad}"
    scale = gamma * jax.lax.rsqrt(rvar + 1e-5)                   # (1, a_dim)
    shift = beta - rmean * scale                                 # (1, a_dim)

    def padc(x):  # pad last dim up to a_pad with zeros
        return jnp.pad(x, ((0, 0), (0, a_pad - a_dim)))

    W_fused = jnp.concatenate([padc(Wm), padc(Wv)], axis=1)      # (z_dim, 2*a_pad)
    params = jnp.concatenate(
        [padc(bm), padc(bv), padc(scale), padc(shift)], axis=0)  # (4, a_pad)
    return W_fused, params


def prep_noise(eps, a_pad=A_PAD):
    """One-time padding of the noise to a lane/sublane-dense (ROWS_PAD, A_PAD) slab.

    Zero-padded lanes/rows guarantee the mu / log_var / padding rows of the
    output slab are produced correctly by the fused kernel expression.
    """
    n_sample, a_dim = eps.shape
    assert a_dim <= a_pad, f"a_dim={a_dim} exceeds single-tile width {a_pad}"
    rows_pad = _round_up(n_sample + 2, 8)
    return jnp.pad(eps, ((0, rows_pad - n_sample), (0, a_pad - a_dim)))


@functools.partial(jax.jit, static_argnames=("n_sample",))
def basenet_forward_packed(Z, W_fused, params, eps_padded, *, n_sample):
    """Returns the packed (ROWS_PAD, A_PAD) output slab (no post-kernel ops)."""
    rows_pad, a_pad = eps_padded.shape
    vmem = pl.BlockSpec(memory_space=pltpu.MemorySpace.VMEM)
    return pl.pallas_call(
        functools.partial(basenet_kernel, n_sample=n_sample, a_pad=a_pad),
        out_shape=jax.ShapeDtypeStruct((rows_pad, a_pad), jnp.float32),
        in_specs=[vmem, vmem, vmem, vmem],
        out_specs=vmem,
    )(Z, W_fused, params, eps_padded)


def unpack_outputs(slab, *, a_dim, n_sample):
    """Thin unpacking meant to be fused into the consumer (single lane trim)."""
    trimmed = slab[:, :a_dim]
    sample = trimmed[:n_sample].reshape(n_sample, 1, a_dim)
    mu = trimmed[n_sample:n_sample + 1]
    log_var = trimmed[n_sample + 1:n_sample + 2]
    return sample, mu, log_var


def init_params(key, z_dim, a_dim):
    k1, k2, k3, k4 = jax.random.split(key, 4)
    lim = 1.0 / jnp.sqrt(z_dim)
    Wm = jax.random.uniform(k1, (z_dim, a_dim), jnp.float32, -lim, lim)
    bm = jax.random.uniform(k2, (1, a_dim), jnp.float32, -lim, lim)
    Wv = jax.random.uniform(k3, (z_dim, a_dim), jnp.float32, -lim, lim)
    bv = jax.random.uniform(k4, (1, a_dim), jnp.float32, -lim, lim)
    # BatchNorm1d default init: gamma=1, beta=0, running_mean=0, running_var=1
    gamma = jnp.ones((1, a_dim), jnp.float32)
    beta = jnp.zeros((1, a_dim), jnp.float32)
    rmean = jnp.zeros((1, a_dim), jnp.float32)
    rvar = jnp.ones((1, a_dim), jnp.float32)
    return Wm, bm, Wv, bv, gamma, beta, rmean, rvar


def _reference(Z, Wm, bm, Wv, bv, gamma, beta, rmean, rvar, eps):
    z_mean = jnp.mean(Z, axis=0, keepdims=True)
    mu = z_mean @ Wm + bm
    h = jnp.tanh(z_mean @ Wv + bv)
    log_var = (h - rmean) * jax.lax.rsqrt(rvar + 1e-5) * gamma + beta
    std = jnp.exp(0.5 * log_var)
    sample = mu + eps[:, None, :] * std
    return sample, mu, log_var


if __name__ == "__main__":
    N, z_dim, a_dim, n_sample = 8, 32, 16, 8
    key = jax.random.PRNGKey(0)
    kz, kp, ke = jax.random.split(key, 3)

    Z = jax.random.normal(kz, (N, z_dim), jnp.float32)
    raw_params = init_params(kp, z_dim, a_dim)
    eps = jax.random.normal(ke, (n_sample, a_dim), jnp.float32)

    # one-time prep (BN fold + weight fusion + lane/sublane padding)
    W_fused, params = fold_params(*raw_params)
    eps_padded = prep_noise(eps)

    slab = basenet_forward_packed(Z, W_fused, params, eps_padded,
                                  n_sample=n_sample)
    jax.block_until_ready(slab)

    sample, mu, log_var = unpack_outputs(slab, a_dim=a_dim, n_sample=n_sample)
    assert sample.shape == (n_sample, 1, a_dim)
    assert mu.shape == (1, a_dim)
    assert log_var.shape == (1, a_dim)

    # correctness check against a pure-JAX reference of the PyTorch forward
    s_ref, mu_ref, lv_ref = _reference(Z, *raw_params, eps)
    assert jnp.allclose(mu, mu_ref, atol=1e-5, rtol=1e-4)
    assert jnp.allclose(log_var, lv_ref, atol=1e-5, rtol=1e-4)
    assert jnp.allclose(sample, s_ref, atol=1e-5, rtol=1e-4)

    print("KERNEL_OK")
</pallas_src>

<mosaic_0001>
module attributes {stable_mosaic.version = 11 : i64} {
  func.func @basenet_kernel(%arg0: memref<8x32xf32, #tpu.memory_space<vmem>>, %arg1: memref<32x256xf32, #tpu.memory_space<vmem>>, %arg2: memref<4x128xf32, #tpu.memory_space<vmem>>, %arg3: memref<16x128xf32, #tpu.memory_space<vmem>>, %arg4: memref<16x128xf32, #tpu.memory_space<vmem>>) attributes {dimension_semantics = [], scalar_prefetch = 0 : i64, scratch_operands = 0 : i64, tpu.core_type = #tpu.core_type<tc>} {
    %c0 = arith.constant 0 : index
    %c0_0 = arith.constant 0 : index
    %0 = vector.load %arg0[%c0, %c0_0] : memref<8x32xf32, #tpu.memory_space<vmem>>, vector<8x32xf32>
    %c0_1 = arith.constant 0 : index
    %c0_2 = arith.constant 0 : index
    %1 = vector.load %arg1[%c0_1, %c0_2] : memref<32x256xf32, #tpu.memory_space<vmem>>, vector<32x256xf32>
    %cst = arith.constant dense<0.000000e+00> : vector<8x256xf32>
    %2 = tpu.matmul %0, %1, %cst {dimension_numbers = #tpu.dot_dimension_numbers<[1], [0], [0], [1], [0, 0, 1, 1], [], []>} : vector<8x32xf32>, vector<32x256xf32>, vector<8x256xf32> -> vector<8x256xf32>
    %cst_3 = arith.constant dense<0.000000e+00> : vector<256xf32>
    %3 = vector.multi_reduction <add>, %2, %cst_3 [0] : vector<8x256xf32> to vector<256xf32>
    %4 = vector.shape_cast %3 : vector<256xf32> to vector<1x256xf32>
    %cst_4 = arith.constant 1.250000e-01 : f32
    %5 = vector.broadcast %cst_4 : f32 to vector<1x256xf32>
    %6 = arith.mulf %4, %5 : vector<1x256xf32>
    %7 = vector.extract_strided_slice %6 {offsets = [0, 0], sizes = [1, 128], strides = [1, 1]} : vector<1x256xf32> to vector<1x128xf32>
    %c0_5 = arith.constant 0 : index
    %c0_6 = arith.constant 0 : index
    %8 = vector.load %arg2[%c0_5, %c0_6] : memref<4x128xf32, #tpu.memory_space<vmem>>, vector<1x128xf32>
    %9 = arith.addf %7, %8 : vector<1x128xf32>
    %10 = vector.extract_strided_slice %6 {offsets = [0, 128], sizes = [1, 128], strides = [1, 1]} : vector<1x256xf32> to vector<1x128xf32>
    %c1 = arith.constant 1 : index
    %c0_7 = arith.constant 0 : index
    %11 = vector.load %arg2[%c1, %c0_7] : memref<4x128xf32, #tpu.memory_space<vmem>>, vector<1x128xf32>
    %12 = arith.addf %10, %11 : vector<1x128xf32>
    %13 = math.tanh %12 : vector<1x128xf32>
    %c2 = arith.constant 2 : index
    %c0_8 = arith.constant 0 : index
    %14 = vector.load %arg2[%c2, %c0_8] : memref<4x128xf32, #tpu.memory_space<vmem>>, vector<1x128xf32>
    %15 = arith.mulf %13, %14 : vector<1x128xf32>
    %c3 = arith.constant 3 : index
    %c0_9 = arith.constant 0 : index
    %16 = vector.load %arg2[%c3, %c0_9] : memref<4x128xf32, #tpu.memory_space<vmem>>, vector<1x128xf32>
    %17 = arith.addf %15, %16 : vector<1x128xf32>
    %cst_10 = arith.constant 5.000000e-01 : f32
    %18 = vector.broadcast %cst_10 : f32 to vector<1x128xf32>
    %19 = arith.mulf %18, %17 : vector<1x128xf32>
    %20 = math.exp %19 : vector<1x128xf32>
    %21 = tpu.iota {dimensions = array<i32: 0>} : vector<16x128xi32>
    %c9_i32 = arith.constant 9 : i32
    %22 = vector.broadcast %c9_i32 : i32 to vector<16x128xi32>
    %23 = arith.cmpi eq, %21, %22 : vector<16x128xi32>
    %24 = vector.shape_cast %17 : vector<1x128xf32> to vector<1x128xf32>
    %25 = vector.broadcast %24 : vector<1x128xf32> to vector<16x128xf32>
    %26 = vector.shape_cast %9 : vector<1x128xf32> to vector<1x128xf32>
    %27 = vector.broadcast %26 : vector<1x128xf32> to vector<16x128xf32>
    %28 = arith.select %23, %25, %27 : vector<16x128xi1>, vector<16x128xf32>
    %c0_11 = arith.constant 0 : index
    %c0_12 = arith.constant 0 : index
    %29 = vector.load %arg3[%c0_11, %c0_12] : memref<16x128xf32, #tpu.memory_space<vmem>>, vector<16x128xf32>
    %30 = vector.broadcast %20 : vector<1x128xf32> to vector<16x128xf32>
    %31 = arith.mulf %29, %30 : vector<16x128xf32>
    %32 = arith.addf %28, %31 : vector<16x128xf32>
    %c0_13 = arith.constant 0 : index
    %c0_14 = arith.constant 0 : index
    %33 = vector.load %arg4[%c0_13, %c0_14] : memref<16x128xf32, #tpu.memory_space<vmem>>, vector<16x128xf32>
    tpu.vector_store %arg4[%c0_13, %c0_14], %32 {strides = array<i32>} : memref<16x128xf32, #tpu.memory_space<vmem>>, vector<16x128xf32>,
    return
  }
}

</mosaic_0001>

<bundles_post_ra>
// kernel: basenet_forward_packed.1
= control target key start
LH: loop header
LB: loop body
LE: loop exit
PB: predicated region body
PF: predicated region fallthrough
CT: control target
= control target key end

     0   :  { %9 = vsyncpa [#allocation3], 0  ;;  %s404_s0 = inlined_call_operand.hbm [shape: f32[8,32], index: 0, kind: input, shape index: {}]   ;;  %s405_s1 = inlined_call_operand.hbm [shape: f32[32,256], index: 1, kind: input, shape index: {}]   ;;  %s406_s2 = inlined_call_operand.hbm [shape: f32[4,128], index: 2, kind: input, shape index: {}]   ;;  %s407_s3 = inlined_call_operand.hbm [shape: f32[16,128], index: 3, kind: input, shape index: {}]   ;;  %s408_s4 = inlined_call_operand.hbm [shape: f32[16,128], index: 4, kind: output, shape index: {}]  }
   0x1   :  { %10 = vsyncpa [#allocation6], 0 }
   0x2   :  { %11 = vsyncpa [#allocation9], 0 }
   0x3   :  { %12 = vsyncpa [#allocation4], 0  ;;  %s348_s15 = smov [#allocation5]  }
   0x4   :  { %s28_s16 = sshll.u32 %s348_s15, 4  ;;  %s29_s16 = int_to_ptr.vmem [resolvable:$true] %s28_s16 }
   0x5   :  { %s248_s17 = scalar_lea.vmem %s29_s16, 1024  ;;  %p253_p1 = scmp.lt.s32.totalorder %s29_s16, %s29_s16 }
   0x6   :  { %p249_p0 = scmp.ne.s32.totalorder %s29_s16, %s248_s17  ;;  %p254_p2 = scmp.lt.s32.totalorder %s248_s17, %s248_s17 }
   0x8   :  { %p255_p3 = por %p254_p2, %p253_p1 }
   0xa   :  { %p256_p4 = pnand %p255_p3, %p249_p0 }
   0xc   :  { %259 = shalt.err (!%p256_p4)
}
   0xd   :  { %s349_s18 = smov 256   ;;  %s350_s19 = smov 16  }
   0xe   :  { %34 = dma.hbm_to_vmem [thread:$0]  %s405_s1, 1024, %s29_s16, [#allocation6], %s349_s18, %s349_s18, %s350_s19  }
   0xf   :  { %s351_s22 = smov [#allocation2]   ;;  %s352_s24 = smov [#allocation7]  }
  0x10   :  { %s19_s23 = sshll.u32 %s351_s22, 4  ;;  %s41_s25 = sshll.u32 %s352_s24, 4  ;;  %s20_s23 = int_to_ptr.vmem [resolvable:$true] %s19_s23  ;;  %s42_s25 = int_to_ptr.vmem [resolvable:$true] %s41_s25 }
  0x11   :  { %s268_s26 = scalar_lea.vmem %s20_s23, 128  ;;  %p273_p6 = scmp.lt.s32.totalorder %s20_s23, %s20_s23 }
  0x12   :  { %p269_p5 = scmp.ne.s32.totalorder %s20_s23, %s268_s26  ;;  %p274_p7 = scmp.lt.s32.totalorder %s268_s26, %s268_s26 }
  0x14   :  { %p275_p8 = por %p274_p7, %p273_p6 }
  0x16   :  { %p276_p9 = pnand %p275_p8, %p269_p5 }
  0x18   :  { %279 = shalt.err (!%p276_p9)
}
  0x19   :  { %22 = dma.hbm_to_vmem [thread:$0]  %s404_s0, 128, %s20_s23, [#allocation3]  }
  0x1a   :  { %s288_s29 = scalar_lea.vmem %s42_s25, 64  ;;  %p293_p11 = scmp.lt.s32.totalorder %s42_s25, %s42_s25 }
  0x1b   :  { %p289_p10 = scmp.ne.s32.totalorder %s42_s25, %s288_s29  ;;  %p294_p12 = scmp.lt.s32.totalorder %s288_s29, %s288_s29 }
  0x1d   :  { %p295_p13 = por %p294_p12, %p293_p11 }
  0x1f   :  { %p296_p0 = pnand %p295_p13, %p289_p10 }
  0x21   :  { %299 = shalt.err (!%p296_p0)
}
  0x22   :  { %44 = dma.hbm_to_vmem [thread:$0]  %s406_s2, 64, %s42_s25, [#allocation6]  }
  0x23   :  { %s353_s5 = smov [#allocation8]  }
  0x24   :  { %s50_s6 = sshll.u32 %s353_s5, 4  ;;  %s51_s6 = int_to_ptr.vmem [resolvable:$true] %s50_s6 }
  0x25   :  { %s308_s7 = scalar_lea.vmem %s51_s6, 256  ;;  %p313_p2 = scmp.lt.s32.totalorder %s51_s6, %s51_s6 }
  0x26   :  { %p309_p1 = scmp.ne.s32.totalorder %s51_s6, %s308_s7  ;;  %p314_p3 = scmp.lt.s32.totalorder %s308_s7, %s308_s7 }
  0x28   :  { %p315_p4 = por %p314_p3, %p313_p2 }
  0x2a   :  { %p316_p5 = pnand %p315_p4, %p309_p1 }
  0x2c   :  { %319 = shalt.err (!%p316_p5)
}
  0x2d   :  { %s354_s0 = smov 128   ;;  %s355_s8 = smov 8  }
  0x2e   :  { %56 = dma.hbm_to_vmem [thread:$0]  %s407_s3, 256, %s51_s6, [#allocation9], %s354_s0, %s354_s0, %s355_s8  }
  0x2f   :  { %340 = dma.done.wait [#allocation3], 128  }
  0x30   :  { %341 = vsyncadd [#allocation3], 4294967168 }
  0x31   :  { %342 = dma.done.wait [#allocation6], 1088  }
  0x32   :  { %343 = vsyncadd [#allocation6], 4294966208 }
  0x33   :  { %344 = dma.done.wait [#allocation9], 256  }
  0x34   :  { %345 = vsyncadd [#allocation9], 4294967040  ;;  %v356_v0 = vmov 0.0   ;;  %v77_v1 = vld [vmem:[#allocation5 + $0x38] sm:$0xff]  ;;  %v76_v2 = vld [vmem:[#allocation5 + $0x30] sm:$0xff]  ;;  %vm78_vm0 = vcmask 261120   ;;  %v179_v34 = vlaneseq }
  0x35   :  { %146 = vmatprep.mubr.f32.mxu0 %v356_v0  ;;  %v75_v3 = vld [vmem:[#allocation5 + $0x28] sm:$0xff]  ;;  %106 = vmatprep.subr.mxu0 %v77_v1  ;;  %v74_v4 = vld [vmem:[#allocation5 + $0x20] sm:$0xff]  ;;  %v73_v5 = vld [vmem:[#allocation5 + $0x18] sm:$0xff]  ;;  %s357_s2 = smov [#allocation10]  }
  0x36   :  { %107 = vmatpush1.msra.mxu0 %v76_v2  ;;  %v72_v6 = vld [vmem:[#allocation5 + $0x10] sm:$0xff]  ;;  %v71_v7 = vld [vmem:[#allocation5 + $0x8] sm:$0xff]  ;;  %v70_v8 = vld [vmem:[#allocation5] sm:$0xff]  ;;  %v180_v36 = vshrl.u32 %v179_v34, 7  ;;  %s211_s3 = sshll.u32 %s357_s2, 4  ;;  %s212_s3 = int_to_ptr.vmem [resolvable:$true] %s211_s3 }
  0x37   :  { %108 = vmatprep.subr.mxu0 %v75_v3  ;;  %v69_v9 = vld [vmem:[#allocation2] sm:$0xff]  ;;  %v169_v18 = vld [vmem:[#allocation7 + $0x1] sm:$0x1]  ;;  %v172_v23 = vld [vmem:[#allocation7 + $0x2] sm:$0x1]  ;;  %s320_s11 = scalar_lea.vmem %s212_s3, 256  ;;  %p325_p7 = scmp.lt.s32.totalorder %s212_s3, %s212_s3 }
  0x38   :  { %109 = vmatpush1.msra.mxu0 %v74_v4  ;;  %v174_v26 = vld [vmem:[#allocation7 + $0x3] sm:$0x1]  ;;  %v167_v37 = vld [vmem:[#allocation7] sm:$0x1]  ;;  %v181_v38 = vadd.s32 8, %v180_v36  ;;  %v186_v40 = vsub.s32 0, %v180_v36  ;;  %p321_p6 = scmp.ne.s32.totalorder %s212_s3, %s320_s11  ;;  %p326_p8 = scmp.lt.s32.totalorder %s320_s11, %s320_s11 }
  0x39   :  { %110 = vmatprep.subr.mxu0 %v73_v5  ;;  %v194_v43 = vld [vmem:[#allocation8] sm:$0xff]  ;;  %v195_v44 = vld [vmem:[#allocation8 + $0x8] sm:$0xff] }
  0x3a   :  { %111 = vmatpush1.msra.mxu0 %v72_v6  ;;  %vm183_vm1 = vcmp.eq.s32.totalorder %v181_v38, 9  ;;  %p327_p9 = por %p326_p8, %p325_p7 }
  0x3b   :  { %112 = vmatprep.subr.mxu0 %v71_v7 }
  0x3c   :  { %113 = vmatpush1.msra.mxu0 %v70_v8  ;;  %p328_p10 = pnand %p327_p9, %p321_p6 }
  0x3d   :  { %225 = vmatmul.mubr.msk.f32.vlgmr.msra.gmra.mxu0 %vm78_vm0, %v69_v9 }
  0xfd   :  { %v148_v10 = vpop.f32.mrf.mxu0 }
  0xfe   :  { %v153_v21 = vrot.slane %v148_v10, 4 }
  0xff   :  { %v150_v11 = vpop.f32.mrf.mxu0 }
 0x100   :  { %v159_v12 = vrot.slane %v150_v11, 4  ;;  %v154_v22 = vadd.f32 %v153_v21, %v148_v10 }
 0x102   :  { %v160_v13 = vadd.f32 %v159_v12, %v150_v11  ;;  %v155_v25 = vrot.slane %v154_v22, 2 }
 0x104   :  { %v161_v14 = vrot.slane %v160_v13, 2  ;;  %v156_v29 = vadd.f32 %v155_v25, %v154_v22 }
 0x106   :  { %v162_v15 = vadd.f32 %v161_v14, %v160_v13  ;;  %v157_v32 = vrot.slane %v156_v29, 1 }
 0x108   :  { %v163_v16 = vrot.slane %v162_v15, 1  ;;  %v158_v33 = vadd.f32 %v157_v32, %v156_v29 }
 0x10a   :  { %v164_v17 = vadd.f32 %v163_v16, %v162_v15  ;;  %v165_v35 = vmul.f32 0.125, %v158_v33 }
 0x10c   :  { %v166_v19 = vmul.f32 0.125, %v164_v17  ;;  %v168_v39 = vadd.f32 %v167_v37, %v165_v35 }
 0x10e   :  { %v170_v20 = vadd.f32 %v169_v18, %v166_v19  ;;  %v191_v46 = vrot.slane %v168_v39, %v186_v40 }
 0x110   :  { %236 = vtanh.f32 %v170_v20 }
 0x11d   :  { %v237_v24 = vpop.eup %236 }
 0x11e   :  { %v173_v27 = vmul.f32 %v237_v24, %v172_v23 }
 0x120   :  { %v175_v28 = vadd.f32 %v174_v26, %v173_v27 }
 0x122   :  { %v176_v30 = vmul.f32 0.5, %v175_v28  ;;  %v187_v42 = vrot.slane %v175_v28, %v186_v40 }
 0x124   :  { %v177_v31 = vmul.f32 1.442695, %v176_v30  ;;  %v193_v49 = vsel %vm183_vm1, %v187_v42, %v191_v46 }
 0x126   :  { %238 = vpow2.f32 %v177_v31 }
 0x133   :  { %v239_v41 = vpop.eup %238 }
 0x134   :  { %v199_v45 = vrot.slane %v239_v41, %v186_v40 }
 0x136   :  { %v200_v47 = vmul.f32 %v199_v45, %v194_v43  ;;  %v201_v48 = vmul.f32 %v199_v45, %v195_v44 }
 0x138   :  { %v202_v50 = vadd.f32 %v200_v47, %v191_v46  ;;  %v203_v51 = vadd.f32 %v201_v48, %v193_v49 }
 0x13a   :  { %204 = vst [vmem:[#allocation10] sm:$0xff] %v202_v50  ;;  %205 = vst [vmem:[#allocation10 + $0x8] sm:$0xff] %v203_v51 }
 0x13b   :  { %331 = shalt.err (!%p328_p10)
}
 0x13c   :  { %217 = dma.vmem_to_hbm [thread:$0]  %s212_s3, 256, %s408_s4, [#allocation4], %s354_s0, %s354_s0, %s355_s8  }
 0x13d   :  { %346 = dma.done.wait [#allocation4], 256  }
 0x13e   :  { %347 = vsyncadd [#allocation4], 4294967040 }
 0x13f   :  { %221 = vsyncpa [#allocation3], 1 }
 0x140   :  { %222 = vsyncpa [#allocation6], 1 }
 0x141   :  { %223 = vsyncpa [#allocation9], 1 }
 0x142   :  { %224 = vsyncpa [#allocation4], 1 }

</bundles_post_ra>
